<compile_context>
chip_gen: v5e
topology: v5e:2x2
jax: 0.10.0
libtpu: 0.0.40
codegen_flags: <defaults>
</compile_context>

<pallas_src>
import functools

import jax
import jax.numpy as jnp
from jax.experimental import pallas as pl
from jax.experimental.pallas import tpu as pltpu


SQRT_2_OVER_PI = 0.7978845608028654
GELU_COEFF = 0.044715

_VMEM_BUDGET = 22 * 1024 * 1024       # soft budget; stays under 32 MiB scoped limit
_VMEM_LIMIT = 32 * 1024 * 1024        # safe on v5e/v6e (128 MiB) and v7x (64 MiB)


def _round_up(x: int, m: int) -> int:
    return ((x + m - 1) // m) * m


def _largest_div_tile(n_pad: int, cap: int):
    """Largest multiple of 128 that divides n_pad and is <= cap (None if impossible)."""
    cap = min(cap, n_pad)
    if cap < 128:
        return None
    m = n_pad // 128
    best = None
    for d in range(1, m + 1):
        if m % d == 0 and 128 * d <= cap:
            best = 128 * d
    return best


def _choose_tiles(B: int, K: int, N_pad: int):
    """Pick (tb, tn, tk, B_pad, num_k) under the VMEM budget."""
    B8 = _round_up(B, 8)
    tb = min(256, B8)
    # v7x has 2 TensorCores: prefer >= 2 batch tiles when the batch allows it.
    if B8 >= 16 and (B8 + tb - 1) // tb < 2:
        tb = _round_up((B8 + 1) // 2, 8)
    B_pad = _round_up(B8, tb)

    # double-buffered (tb,128) output tile + (tb,128) max accumulator
    fixed = 3 * tb * 128 * 4
    avail = _VMEM_BUDGET - fixed

    # 1) whole K in one block (no K tiling); make the weight fully resident if possible.
    rem = avail - 2 * tb * K * 4
    if rem > 0:
        tn_fit = rem // (4 * (2 * K + 2))
        tn = _largest_div_tile(N_pad, tn_fit)
        if tn is not None:
            return tb, tn, K, B_pad, 1

    # 2) K tiling: tk must be a multiple of 128 that divides K (x last-dim constraint).
    for tk in (2048, 1024, 512, 256, 128):
        if K % tk != 0:
            continue
        rem = avail - 2 * tb * tk * 4
        if rem <= 0:
            continue
        tn_fit = rem // (4 * (2 * tk + 2 + tb))       # + tb*tn f32 matmul accumulator
        tn = _largest_div_tile(N_pad, min(tn_fit, 2048))
        if tn is not None:
            return tb, tn, tk, B_pad, K // tk

    # 3) fallback (K huge and not a multiple of 128): whole K, minimal tn.
    tn = _largest_div_tile(N_pad, 128) or 128
    return tb, tn, K, B_pad, 1


def _fused_kernel(x_ref, wt_ref, b_ref, o_ref, max_ref, *mm_scratch,
                  half_scale, tn, num_k):
    """One (batch-tile, feature-tile, k-tile) grid step.

    x_ref  : (tb, tk)   f32
    wt_ref : (tk, tn)   f32   (pre-transposed weight tile)
    b_ref  : (1, tn)    f32
    o_ref  : (tb, 128)  f32   (lane-dense output; per-row max broadcast over lanes)
    max_ref: (tb, 128)  f32   running 128-lane-wide max across feature/k tiles
    mm_scratch (only if num_k > 1): (tb, tn) f32 matmul accumulator
    """
    n = pl.program_id(1)
    k = pl.program_id(2)

    @pl.when((n == 0) & (k == 0))
    def _init():
        max_ref[...] = jnp.full(max_ref.shape, -jnp.inf, max_ref.dtype)

    def epilogue(y):
        # tanh-approx GELU with scale_factor folded into the 0.5 constant:
        #   scale * 0.5 * y * (1 + tanh(c1 * (y + c2*y^3)))
        inner = SQRT_2_OVER_PI * (y + GELU_COEFF * (y * (y * y)))
        s = (half_scale * y) * (1.0 + jnp.tanh(inner))
        # Fold into a 128-lane-wide running max (static slices, pure VPU; no XLU work).
        m = max_ref[...]
        for c in range(tn // 128):
            m = jnp.maximum(m, s[:, c * 128:(c + 1) * 128])
        max_ref[...] = m

    if num_k == 1:
        y = jnp.dot(x_ref[...], wt_ref[...],
                    preferred_element_type=jnp.float32) + b_ref[...]
        epilogue(y)
    else:
        mm_ref = mm_scratch[0]

        @pl.when(k == 0)
        def _zero():
            mm_ref[...] = jnp.zeros_like(mm_ref)

        mm_ref[...] += jnp.dot(x_ref[...], wt_ref[...],
                               preferred_element_type=jnp.float32)

        @pl.when(k == num_k - 1)
        def _epi():
            epilogue(mm_ref[...] + b_ref[...])

    @pl.when((n == pl.num_programs(1) - 1) & (k == num_k - 1))
    def _finalize():
        row_max = jnp.max(max_ref[...], axis=-1, keepdims=True)       # (tb, 1)
        o_ref[...] = jnp.broadcast_to(row_max, o_ref.shape)           # lane-dense store


def prepare_params(weight, bias):
    """One-time parameter prep (hoisted out of the per-call path).

    weight: (OutP, In) -> w_t: (In, N_pad) with the feature dim padded to a
    multiple of 128 by edge replication (duplicated columns never change the max).
    bias: (OutP,) -> (1, N_pad).
    """
    OutP, _ = weight.shape
    N_pad = _round_up(OutP, 128)
    w_t = weight.T
    b2d = bias.reshape(1, OutP)
    if N_pad != OutP:
        w_t = jnp.pad(w_t, ((0, 0), (0, N_pad - OutP)), mode="edge")
        b2d = jnp.pad(b2d, ((0, 0), (0, N_pad - OutP)), mode="edge")
    return w_t, b2d


def fused_linear_gelu_scale_max(x, w_t, b2d, scale_factor):
    """x: (B, In) f32; w_t: (In, N_pad) f32; b2d: (1, N_pad) f32 -> (B,) f32."""
    B, In = x.shape
    K, N_pad = w_t.shape
    assert K == In, (K, In)
    assert N_pad % 128 == 0, N_pad

    tb, tn, tk, B_pad, num_k = _choose_tiles(B, K, N_pad)
    num_i = B_pad // tb
    num_n = N_pad // tn

    if B_pad != B:
        x = jnp.pad(x, ((0, B_pad - B), (0, 0)))     # zero rows, sliced off afterwards

    grid = (num_i, num_n, num_k)

    kernel = functools.partial(
        _fused_kernel,
        half_scale=0.5 * float(scale_factor),
        tn=tn,
        num_k=num_k,
    )

    scratch_shapes = [pltpu.VMEM((tb, 128), jnp.float32)]          # running max
    if num_k > 1:
        scratch_shapes.append(pltpu.VMEM((tb, tn), jnp.float32))   # matmul accumulator

    # Honest HBM traffic: weight is fetched once if fully resident, else once per
    # batch tile; x is re-streamed per feature tile only when K is split.
    weight_streams = 1 if (num_n == 1 and num_k == 1) else num_i
    x_streams = 1 if num_k == 1 else num_n
    cost = pl.CostEstimate(
        flops=2 * B_pad * N_pad * K,
        transcendentals=B_pad * N_pad,
        bytes_accessed=4 * (B_pad * K * x_streams
                            + K * N_pad * weight_streams
                            + N_pad
                            + B_pad * 128),
    )

    out = pl.pallas_call(
        kernel,
        out_shape=jax.ShapeDtypeStruct((B_pad, 128), jnp.float32),
        grid_spec=pltpu.PrefetchScalarGridSpec(
            num_scalar_prefetch=0,
            grid=grid,
            in_specs=[
                pl.BlockSpec((tb, tk), lambda i, n, k: (i, k)),   # x tile
                pl.BlockSpec((tk, tn), lambda i, n, k: (k, n)),   # weight^T tile
                pl.BlockSpec((1, tn), lambda i, n, k: (0, n)),    # bias tile
            ],
            out_specs=pl.BlockSpec((tb, 128), lambda i, n, k: (i, 0)),  # resident over n,k
            scratch_shapes=scratch_shapes,
        ),
        compiler_params=pltpu.CompilerParams(
            dimension_semantics=("parallel", "arbitrary", "arbitrary"),
            vmem_limit_bytes=_VMEM_LIMIT,
        ),
        cost_estimate=cost,
    )(x, w_t, b2d)

    return out[:B, 0]


def make_params(key, in_features, out_features, pool_kernel_size):
    """Deterministically build the pool-averaged Linear parameters,
    mirroring the PyTorch __init__ (temp Linear weights averaged over pool groups)."""
    kw, kb = jax.random.split(key)
    bound = 1.0 / jnp.sqrt(in_features)
    temp_w = jax.random.uniform(
        kw, (out_features, in_features), jnp.float32, -bound, bound
    )
    temp_b = jax.random.uniform(kb, (out_features,), jnp.float32, -bound, bound)

    out_pooled = out_features // pool_kernel_size
    weight = temp_w.reshape(out_pooled, pool_kernel_size, in_features).mean(axis=1)
    bias = temp_b.reshape(out_pooled, pool_kernel_size).mean(axis=1)
    return weight, bias


def reference(x, weight, bias, scale_factor):
    y = x @ weight.T + bias
    g = 0.5 * y * (1.0 + jnp.tanh(SQRT_2_OVER_PI * (y + GELU_COEFF * y * y * y)))
    return jnp.max(g * scale_factor, axis=-1)


if __name__ == "__main__":
    in_features = 32
    out_features = 64
    pool_kernel_size = 2
    scale_factor = 0.5
    batch = 8

    key = jax.random.PRNGKey(0)
    kx, kp = jax.random.split(key)

    x = jax.random.normal(kx, (batch, in_features), jnp.float32)
    weight, bias = make_params(kp, in_features, out_features, pool_kernel_size)

    # One-time parameter prep (transpose + feature pad) hoisted out of the call path.
    w_t, b2d = prepare_params(weight, bias)

    run = jax.jit(functools.partial(fused_linear_gelu_scale_max,
                                    scale_factor=scale_factor))
    out = jax.block_until_ready(run(x, w_t, b2d))

    ref = reference(x, weight, bias, scale_factor)
    assert out.shape == (batch,), out.shape
    assert jnp.allclose(out, ref, atol=1e-5, rtol=1e-5), (out, ref)

    print("KERNEL_OK")
</pallas_src>

<mosaic_0001>
module attributes {stable_mosaic.version = 11 : i64} {
  func.func @_fused_kernel(%arg0: i32, %arg1: i32, %arg2: i32, %arg3: memref<8x32xf32, #tpu.memory_space<vmem>>, %arg4: memref<32x128xf32, #tpu.memory_space<vmem>>, %arg5: memref<1x128xf32, #tpu.memory_space<vmem>>, %arg6: memref<8x128xf32, #tpu.memory_space<vmem>>, %arg7: memref<8x128xf32, #tpu.memory_space<vmem>>) attributes {dimension_semantics = [#tpu.dimension_semantics<parallel>, #tpu.dimension_semantics<arbitrary>, #tpu.dimension_semantics<arbitrary>], iteration_bounds = array<i64: 1, 1, 1>, scalar_prefetch = 0 : i64, scratch_operands = 1 : i64, tpu.core_type = #tpu.core_type<tc>, window_params = [{transform_indices = @transform_0, window_bounds = array<i64: 8, 32>}, {transform_indices = @transform_1, window_bounds = array<i64: 32, 128>}, {transform_indices = @transform_2, window_bounds = array<i64: 1, 128>}, {transform_indices = @transform_3, window_bounds = array<i64: 8, 128>}]} {
    %c0_i32 = arith.constant 0 : i32
    %0 = arith.cmpi eq, %arg1, %c0_i32 : i32
    %c0_i32_0 = arith.constant 0 : i32
    %1 = arith.cmpi eq, %arg2, %c0_i32_0 : i32
    %2 = arith.andi %0, %1 : i1
    %3 = arith.extui %2 : i1 to i32
    %c0_i32_1 = arith.constant 0 : i32
    %4 = arith.cmpi ne, %3, %c0_i32_1 : i32
    scf.if %4 {
      %cst_18 = arith.constant 0xFF800000 : f32
      %32 = vector.broadcast %cst_18 : f32 to vector<8x128xf32>
      %c0_19 = arith.constant 0 : index
      %c0_20 = arith.constant 0 : index
      %33 = vector.load %arg7[%c0_19, %c0_20] : memref<8x128xf32, #tpu.memory_space<vmem>>, vector<8x128xf32>
      tpu.vector_store %arg7[%c0_19, %c0_20], %32 {strides = array<i32>} : memref<8x128xf32, #tpu.memory_space<vmem>>, vector<8x128xf32>,
    } else {
    }
    %c0 = arith.constant 0 : index
    %c0_2 = arith.constant 0 : index
    %5 = vector.load %arg3[%c0, %c0_2] : memref<8x32xf32, #tpu.memory_space<vmem>>, vector<8x32xf32>
    %c0_3 = arith.constant 0 : index
    %c0_4 = arith.constant 0 : index
    %6 = vector.load %arg4[%c0_3, %c0_4] : memref<32x128xf32, #tpu.memory_space<vmem>>, vector<32x128xf32>
    %cst = arith.constant dense<0.000000e+00> : vector<8x128xf32>
    %7 = tpu.matmul %5, %6, %cst {dimension_numbers = #tpu.dot_dimension_numbers<[1], [0], [0], [1], [0, 0, 1, 1], [], []>} : vector<8x32xf32>, vector<32x128xf32>, vector<8x128xf32> -> vector<8x128xf32>
    %c0_5 = arith.constant 0 : index
    %c0_6 = arith.constant 0 : index
    %8 = vector.load %arg5[%c0_5, %c0_6] : memref<1x128xf32, #tpu.memory_space<vmem>>, vector<1x128xf32>
    %9 = vector.broadcast %8 : vector<1x128xf32> to vector<8x128xf32>
    %10 = arith.addf %7, %9 : vector<8x128xf32>
    %11 = arith.mulf %10, %10 : vector<8x128xf32>
    %12 = arith.mulf %10, %11 : vector<8x128xf32>
    %cst_7 = arith.constant 4.471500e-02 : f32
    %13 = vector.broadcast %cst_7 : f32 to vector<8x128xf32>
    %14 = arith.mulf %13, %12 : vector<8x128xf32>
    %15 = arith.addf %10, %14 : vector<8x128xf32>
    %cst_8 = arith.constant 0.797884583 : f32
    %16 = vector.broadcast %cst_8 : f32 to vector<8x128xf32>
    %17 = arith.mulf %16, %15 : vector<8x128xf32>
    %cst_9 = arith.constant 2.500000e-01 : f32
    %18 = vector.broadcast %cst_9 : f32 to vector<8x128xf32>
    %19 = arith.mulf %18, %10 : vector<8x128xf32>
    %20 = math.tanh %17 : vector<8x128xf32>
    %cst_10 = arith.constant 1.000000e+00 : f32
    %21 = vector.broadcast %cst_10 : f32 to vector<8x128xf32>
    %22 = arith.addf %21, %20 : vector<8x128xf32>
    %23 = arith.mulf %19, %22 : vector<8x128xf32>
    %c0_11 = arith.constant 0 : index
    %c0_12 = arith.constant 0 : index
    %24 = vector.load %arg7[%c0_11, %c0_12] : memref<8x128xf32, #tpu.memory_space<vmem>>, vector<8x128xf32>
    %25 = arith.maximumf %24, %23 : vector<8x128xf32>
    %c0_13 = arith.constant 0 : index
    %c0_14 = arith.constant 0 : index
    %26 = vector.load %arg7[%c0_13, %c0_14] : memref<8x128xf32, #tpu.memory_space<vmem>>, vector<8x128xf32>
    tpu.vector_store %arg7[%c0_13, %c0_14], %25 {strides = array<i32>} : memref<8x128xf32, #tpu.memory_space<vmem>>, vector<8x128xf32>,
    %c0_i32_15 = arith.constant 0 : i32
    %27 = arith.cmpi eq, %arg1, %c0_i32_15 : i32
    %c0_i32_16 = arith.constant 0 : i32
    %28 = arith.cmpi eq, %arg2, %c0_i32_16 : i32
    %29 = arith.andi %27, %28 : i1
    %30 = arith.extui %29 : i1 to i32
    %c0_i32_17 = arith.constant 0 : i32
    %31 = arith.cmpi ne, %30, %c0_i32_17 : i32
    scf.if %31 {
      %c0_18 = arith.constant 0 : index
      %c0_19 = arith.constant 0 : index
      %32 = vector.load %arg7[%c0_18, %c0_19] : memref<8x128xf32, #tpu.memory_space<vmem>>, vector<8x128xf32>
      %cst_20 = arith.constant dense<0xFF800000> : vector<8xf32>
      %33 = vector.multi_reduction <maximumf>, %32, %cst_20 [1] : vector<8x128xf32> to vector<8xf32>
      %34 = vector.shape_cast %33 : vector<8xf32> to vector<8x1xf32>
      %35 = vector.shape_cast %34 : vector<8x1xf32> to vector<8x1xf32>
      %36 = vector.broadcast %35 : vector<8x1xf32> to vector<8x128xf32>
      %c0_21 = arith.constant 0 : index
      %c0_22 = arith.constant 0 : index
      %37 = vector.load %arg6[%c0_21, %c0_22] : memref<8x128xf32, #tpu.memory_space<vmem>>, vector<8x128xf32>
      tpu.vector_store %arg6[%c0_21, %c0_22], %36 {strides = array<i32>} : memref<8x128xf32, #tpu.memory_space<vmem>>, vector<8x128xf32>,
    } else {
    }
    return
  }
  func.func @transform_0(%arg0: i32, %arg1: i32, %arg2: i32) -> (i32, i32) {
    %c0_i32 = arith.constant 0 : i32
    return %arg0, %arg2 : i32, i32
  }
  func.func @transform_1(%arg0: i32, %arg1: i32, %arg2: i32) -> (i32, i32) {
    %c0_i32 = arith.constant 0 : i32
    return %arg2, %arg1 : i32, i32
  }
  func.func @transform_2(%arg0: i32, %arg1: i32, %arg2: i32) -> (i32, i32) {
    %c0_i32 = arith.constant 0 : i32
    %c0_i32_0 = arith.constant 0 : i32
    return %c0_i32, %arg1 : i32, i32
  }
  func.func @transform_3(%arg0: i32, %arg1: i32, %arg2: i32) -> (i32, i32) {
    %c0_i32 = arith.constant 0 : i32
    %c0_i32_0 = arith.constant 0 : i32
    return %arg0, %c0_i32 : i32, i32
  }
}

</mosaic_0001>

<bundles_post_ra>
// kernel: fused_linear_gelu_scale_max.1
= control target key start
LH: loop header
LB: loop body
LE: loop exit
PB: predicated region body
PF: predicated region fallthrough
CT: control target
= control target key end

     0   :  { %8 = vsyncpa [#allocation4], 0  ;;  %s204_s0 = inlined_call_operand.hbm [shape: f32[8,32], index: 0, kind: input, shape index: {}]   ;;  %s205_s1 = inlined_call_operand.hbm [shape: f32[32,128], index: 1, kind: input, shape index: {}]   ;;  %s206_s2 = inlined_call_operand.vmem [shape: f32[1,128], index: 2, kind: input, shape index: {}]   ;;  %s207_s3 = inlined_call_operand.vmem [shape: f32[8,128], index: 3, kind: output, shape index: {}]  }
   0x1   :  { %s15_s14 = sshll.u32 %s204_s0, 4  ;;  %s16_s14 = int_to_ptr.hbm [resolvable:$true] %s15_s14 }
   0x2   :  { %9 = vsyncpa [#allocation6], 0  ;;  %s168_s15 = smov [#allocation3]   ;;  %s25_s19 = sshll.u32 %s205_s1, 4  ;;  %s26_s19 = int_to_ptr.hbm [resolvable:$true] %s25_s19 }
   0x3   :  { %s17_s16 = sshll.u32 %s168_s15, 4  ;;  %s169_s20 = smov [#allocation5]   ;;  %s18_s16 = int_to_ptr.vmem [resolvable:$true] %s17_s16 }
   0x4   :  { %20 = dma.hbm_to_vmem [thread:$0]  %s16_s14, 128, %s18_s16, [#allocation4]  }
   0x5   :  { %s27_s21 = sshll.u32 %s169_s20, 4  ;;  %s170_s22 = smov 128   ;;  %s28_s21 = int_to_ptr.vmem [resolvable:$true] %s27_s21 }
   0x6   :  { %s171_s23 = smov 8  }
   0x7   :  { %33 = dma.hbm_to_vmem [thread:$0]  %s26_s19, 512, %s28_s21, [#allocation6], %s170_s22, %s170_s22, %s171_s23  }
   0x8   :  { %164 = dma.done.wait [#allocation4], 128  }
   0x9   :  { %165 = vsyncadd [#allocation4], 4294967168 }
   0xa   :  { %166 = dma.done.wait [#allocation6], 512  }
   0xb   :  { %167 = vsyncadd [#allocation6], 4294966784  ;;  %v55_v0 = vld [vmem:[#allocation5 + $0x18] sm:$0xff]  ;;  %v54_v1 = vld [vmem:[#allocation5 + $0x10] sm:$0xff]  ;;  %vm60_vm0 = vcmask 261120  }
   0xc   :  { %76 = vmatpush.msra.mxu0 %v55_v0  ;;  %v53_v2 = vld [vmem:[#allocation5 + $0x8] sm:$0xff]  ;;  %v52_v3 = vld [vmem:[#allocation5] sm:$0xff]  ;;  %v51_v4 = vld [vmem:[#allocation3] sm:$0xff] }
   0xd   :  { %v113_v5 = vld [vmem:[%s206_s2] ss:$0 sm:$0xff] }
   0xe   :  { %77 = vmatpush.msra.mxu0 %v54_v1 }
  0x10   :  { %78 = vmatpush.msra.mxu0 %v53_v2 }
  0x12   :  { %79 = vmatpush.msra.mxu0 %v52_v3 }
  0x13   :  { %108 = vmatmul.msk.f32.vlgmr.msra.gmra.mxu0 %vm60_vm0, %v51_v4 }
  0x90   :  { %v81_v6 = vpop.f32.mrf.mxu0 }
  0x91   :  { %v82_v7 = vadd.f32 %v113_v5, %v81_v6 }
  0x93   :  { %v84_v8 = vmul.f32 %v82_v7, %v82_v7  ;;  %v89_v14 = vmul.f32 0.25, %v82_v7 }
  0x95   :  { %v85_v9 = vmul.f32 %v84_v8, %v82_v7 }
  0x97   :  { %v86_v10 = vmul.f32 0.044715, %v85_v9 }
  0x99   :  { %v87_v11 = vadd.f32 %v86_v10, %v82_v7 }
  0x9b   :  { %v88_v12 = vmul.f32 0.7978846, %v87_v11 }
  0x9d   :  { %114 = vtanh.f32 %v88_v12 }
  0xa3   :  { %v115_v13 = vpop.eup %114 }
  0xa4   :  { %v91_v15 = vadd.f32 1.0, %v115_v13 }
  0xa6   :  { %v92_v16 = vmul.f32 %v91_v15, %v89_v14 }
  0xa8   :  { %99 = vmax.xlane.f32.xlu0 %v92_v16 }
 0x11b   :  { %v100_v17 = vpop.xlane.xlu0 %99 }
 0x11c   :  { %101 = vst [vmem:[%s207_s3] sm:$0xff] %v100_v17 }
 0x11d   :  { %106 = vsyncpa [#allocation4], 1 }
 0x11e   :  { %107 = vsyncpa [#allocation6], 1 }

</bundles_post_ra>
